<compile_context>
chip_gen: v7x
topology: tpu7x:2x2x1
jax: 0.10.0
libtpu: 0.0.40
codegen_flags: <defaults>
</compile_context>

<pallas_src>
import functools

import jax
import jax.numpy as jnp
from jax.experimental import pallas as pl
from jax.experimental.pallas import tpu as pltpu


def _round_up(x, m):
    return ((x + m - 1) // m) * m


# ----------------------------------------------------------------------------
# Kernel 1: PCA projection   proj = feats @ W
# ----------------------------------------------------------------------------
def _matmul_kernel(x_ref, w_ref, o_ref, acc_ref):
    @pl.when(pl.program_id(2) == 0)
    def _init():
        acc_ref[...] = jnp.zeros_like(acc_ref)

    acc_ref[...] += jnp.dot(x_ref[...], w_ref[...],
                            preferred_element_type=jnp.float32)

    @pl.when(pl.program_id(2) == pl.num_programs(2) - 1)
    def _store():
        o_ref[...] = acc_ref[...].astype(o_ref.dtype)


def _pca_project(feats, w, *, compute_dtype=jnp.float32):
    """feats: (B, F), w: (F, P) -> zero-padded (B_pad, P_pad) f32 projection.

    For production sizes pass compute_dtype=jnp.bfloat16: it halves the HBM
    traffic for W (the dominant bytes) while keeping the f32 MXU accumulator.
    (On v7x, fp8 weight storage with bf16 compute is a further option.)
    """
    B, F = feats.shape
    F2, P = w.shape
    assert F == F2

    # M tile: at least 8 sublanes, up to the MXU row dim. N lane-dense (128).
    tm = min(_round_up(B, 8), 128)
    tn = 128
    tk = 256
    B_pad = _round_up(B, tm)
    P_pad = _round_up(P, tn)
    F_pad = _round_up(F, tk)

    x = jnp.zeros((B_pad, F_pad), compute_dtype).at[:B, :F].set(
        feats.astype(compute_dtype))
    wp = jnp.zeros((F_pad, P_pad), compute_dtype).at[:F, :P].set(
        w.astype(compute_dtype))

    grid = (B_pad // tm, P_pad // tn, F_pad // tk)
    itemsize = jnp.dtype(compute_dtype).itemsize
    cost = pl.CostEstimate(
        flops=2 * B_pad * F_pad * P_pad,
        transcendentals=0,
        bytes_accessed=(B_pad * F_pad + F_pad * P_pad) * itemsize
        + B_pad * P_pad * 4,
    )

    proj = pl.pallas_call(
        _matmul_kernel,
        out_shape=jax.ShapeDtypeStruct((B_pad, P_pad), jnp.float32),
        grid_spec=pltpu.PrefetchScalarGridSpec(
            num_scalar_prefetch=0,
            grid=grid,
            in_specs=[
                pl.BlockSpec((tm, tk), lambda i, j, k: (i, k)),
                pl.BlockSpec((tk, tn), lambda i, j, k: (k, j)),
            ],
            out_specs=pl.BlockSpec((tm, tn), lambda i, j, k: (i, j)),
            scratch_shapes=[pltpu.VMEM((tm, tn), jnp.float32)],
        ),
        compiler_params=pltpu.CompilerParams(
            dimension_semantics=("parallel", "parallel", "arbitrary"),
            vmem_limit_bytes=32 * 1024 * 1024,  # conservative for v7x (64 MiB VMEM)
        ),
        cost_estimate=cost,
    )(x, wp)
    return proj, B_pad, P_pad


# ----------------------------------------------------------------------------
# Kernel 2: pairwise L1 distances   D[i, n] = sum_j |proj[i, j] - res[n, j]|
# ----------------------------------------------------------------------------
def _l1_dist_kernel(q_ref, r_ref, o_ref):
    # q_ref: (TM, P) query tile, r_ref: (TN, P) reference tile, o_ref: (TM, TN).
    q = q_ref[...].astype(jnp.float32)
    r = r_ref[...].astype(jnp.float32)
    diff = jnp.abs(q[:, None, :] - r[None, :, :])   # (TM, TN, P) on the VPU
    o_ref[...] = jnp.sum(diff, axis=-1)             # lane reduce -> (TM, TN)


def _pairwise_l1(proj_pad, res, *, p_pad):
    """proj_pad: (B_pad, P_pad) f32, res: (N_ref, P) -> (B_pad, N_pad) f32."""
    B_pad = proj_pad.shape[0]
    N_ref, P = res.shape

    tm = 8     # B_pad is always a multiple of 8; keeps the 3-D temp small
    tn = 128   # lane-dense output tiles
    N_pad = _round_up(N_ref, tn)

    # Padded reference rows/columns are zero; padded distances are sliced off
    # before the top-k selection, padded feature columns contribute |0-0| = 0.
    res_pad = jnp.zeros((N_pad, p_pad), jnp.float32).at[:N_ref, :P].set(
        res.astype(jnp.float32))

    grid = (B_pad // tm, N_pad // tn)
    cost = pl.CostEstimate(
        flops=3 * B_pad * N_pad * p_pad,  # sub + abs + add per element
        transcendentals=0,
        bytes_accessed=(B_pad * p_pad + N_pad * p_pad + B_pad * N_pad) * 4,
    )

    dists = pl.pallas_call(
        _l1_dist_kernel,
        out_shape=jax.ShapeDtypeStruct((B_pad, N_pad), jnp.float32),
        grid_spec=pltpu.PrefetchScalarGridSpec(
            num_scalar_prefetch=0,
            grid=grid,
            in_specs=[
                pl.BlockSpec((tm, p_pad), lambda i, j: (i, 0)),
                pl.BlockSpec((tn, p_pad), lambda i, j: (j, 0)),
            ],
            out_specs=pl.BlockSpec((tm, tn), lambda i, j: (i, j)),
        ),
        compiler_params=pltpu.CompilerParams(
            dimension_semantics=("parallel", "parallel"),
            vmem_limit_bytes=32 * 1024 * 1024,
        ),
        cost_estimate=cost,
    )(proj_pad, res_pad)
    return dists


# ----------------------------------------------------------------------------
# Forward pass
# ----------------------------------------------------------------------------
def knn_distance_forward(feats, w, res, num_n, *, compute_dtype=jnp.float32):
    """KnnDistance.forward given pre-extracted, flattened VGG features.

    feats: (B, F)     flattened VGG features of the input masks
    w:     (F, P)     PCA basis (self.W = V[:, :num_pc] in the torch module)
    res:   (N_ref, P) pre-projected reference bank (self.res)
    num_n: int        number of nearest neighbours
    Returns a scalar loss matching the torch module.
    """
    B, F = feats.shape
    N_ref, P = res.shape
    assert w.shape == (F, P)

    # 1) PCA projection (tiled MXU matmul).
    proj_pad, _, P_pad = _pca_project(feats, w, compute_dtype=compute_dtype)

    # 2) Pairwise L1 distance matrix.
    dists_pad = _pairwise_l1(proj_pad, res, p_pad=P_pad)

    proj = proj_pad[:B, :P]
    dists = dists_pad[:B, :N_ref]

    # 3) k-nearest selection + final mean.
    # TODO(synk): argsort / top-k and the tiny (B, num_n, P) gather have no clean
    # Pallas TPU equivalent worth a kernel; done in plain JAX on small arrays.
    nn_idx = jnp.argsort(dists, axis=1)[:, :num_n]   # (B, num_n), ascending like torch
    nearest = res[nn_idx]                            # (B, num_n, P)
    # mean over all elements == sum_i mean_i * (1 / B), matching the torch loop.
    loss = jnp.mean(jnp.abs(proj[:, None, :] - nearest))
    return loss


def _reference_forward(feats, w, res, num_n):
    """Pure-JAX replica of the torch forward (loop over the batch)."""
    proj = jnp.dot(feats, w, precision=jax.lax.Precision.HIGHEST)
    per_sample = []
    for i in range(proj.shape[0]):
        d = jnp.abs(proj[i] - res).sum(axis=1)
        idx = jnp.argsort(d)[:num_n]
        per_sample.append(jnp.abs(proj[i] - res[idx]).mean())
    return jnp.stack(per_sample).mean()


if __name__ == "__main__":
    # Small, module-consistent shapes. `feats` stands in for the flattened
    # output of the first requested VGG layer.
    batch = 2        # masks per forward call
    feat_dim = 512   # flattened VGG feature dim (stand-in)
    num_pc = 6       # torch.pca_lowrank default keeps q = 6 components
    n_ref = 256      # size of the precomputed reference bank (self.res)
    num_n = 8        # k nearest neighbours

    key = jax.random.PRNGKey(0)
    k_feat, k_w, k_res = jax.random.split(key, 3)
    feats = jax.random.normal(k_feat, (batch, feat_dim), jnp.float32)
    w = jax.random.normal(k_w, (feat_dim, num_pc), jnp.float32) / jnp.sqrt(
        jnp.float32(feat_dim))
    res = jax.random.normal(k_res, (n_ref, num_pc), jnp.float32)

    # f32 path: exact match against the reference semantics.
    loss = knn_distance_forward(feats, w, res, num_n)
    loss = jax.block_until_ready(loss)

    ref = _reference_forward(feats, w, res, num_n)
    assert loss.shape == ()
    assert jnp.allclose(loss, ref, rtol=1e-3, atol=1e-3), (loss, ref)

    # bf16-weight path (halved HBM traffic for W on v6e/v7x); loose tolerance.
    loss_bf16 = knn_distance_forward(feats, w, res, num_n,
                                     compute_dtype=jnp.bfloat16)
    loss_bf16 = jax.block_until_ready(loss_bf16)
    assert jnp.allclose(loss_bf16, ref, rtol=0.25, atol=0.05), (loss_bf16, ref)

    print("KERNEL_OK")
</pallas_src>

<mosaic_0001>
module attributes {stable_mosaic.version = 11 : i64} {
  func.func @_matmul_kernel(%arg0: i32, %arg1: i32, %arg2: i32, %arg3: memref<8x256xf32, #tpu.memory_space<vmem>>, %arg4: memref<256x128xf32, #tpu.memory_space<vmem>>, %arg5: memref<8x128xf32, #tpu.memory_space<vmem>>, %arg6: memref<8x128xf32, #tpu.memory_space<vmem>>) attributes {dimension_semantics = [#tpu.dimension_semantics<parallel>, #tpu.dimension_semantics<parallel>, #tpu.dimension_semantics<arbitrary>], iteration_bounds = array<i64: 1, 1, 2>, scalar_prefetch = 0 : i64, scratch_operands = 1 : i64, tpu.core_type = #tpu.core_type<tc>, window_params = [{transform_indices = @transform_0, window_bounds = array<i64: 8, 256>}, {transform_indices = @transform_1, window_bounds = array<i64: 256, 128>}, {transform_indices = @transform_2, window_bounds = array<i64: 8, 128>}]} {
    %c0_i32 = arith.constant 0 : i32
    %0 = arith.cmpi eq, %arg2, %c0_i32 : i32
    %1 = arith.extui %0 : i1 to i32
    %c0_i32_0 = arith.constant 0 : i32
    %2 = arith.cmpi ne, %1, %c0_i32_0 : i32
    scf.if %2 {
      %cst_9 = arith.constant 0.000000e+00 : f32
      %12 = vector.broadcast %cst_9 : f32 to vector<8x128xf32>
      %c0_10 = arith.constant 0 : index
      %c0_11 = arith.constant 0 : index
      %13 = vector.load %arg6[%c0_10, %c0_11] : memref<8x128xf32, #tpu.memory_space<vmem>>, vector<8x128xf32>
      tpu.vector_store %arg6[%c0_10, %c0_11], %12 {strides = array<i32>} : memref<8x128xf32, #tpu.memory_space<vmem>>, vector<8x128xf32>,
    } else {
    }
    %c0 = arith.constant 0 : index
    %c0_1 = arith.constant 0 : index
    %3 = vector.load %arg6[%c0, %c0_1] : memref<8x128xf32, #tpu.memory_space<vmem>>, vector<8x128xf32>
    %c0_2 = arith.constant 0 : index
    %c0_3 = arith.constant 0 : index
    %4 = vector.load %arg3[%c0_2, %c0_3] : memref<8x256xf32, #tpu.memory_space<vmem>>, vector<8x256xf32>
    %c0_4 = arith.constant 0 : index
    %c0_5 = arith.constant 0 : index
    %5 = vector.load %arg4[%c0_4, %c0_5] : memref<256x128xf32, #tpu.memory_space<vmem>>, vector<256x128xf32>
    %cst = arith.constant dense<0.000000e+00> : vector<8x128xf32>
    %6 = tpu.matmul %4, %5, %cst {dimension_numbers = #tpu.dot_dimension_numbers<[1], [0], [0], [1], [0, 0, 1, 1], [], []>} : vector<8x256xf32>, vector<256x128xf32>, vector<8x128xf32> -> vector<8x128xf32>
    %7 = arith.addf %3, %6 : vector<8x128xf32>
    %c0_6 = arith.constant 0 : index
    %c0_7 = arith.constant 0 : index
    %8 = vector.load %arg6[%c0_6, %c0_7] : memref<8x128xf32, #tpu.memory_space<vmem>>, vector<8x128xf32>
    tpu.vector_store %arg6[%c0_6, %c0_7], %7 {strides = array<i32>} : memref<8x128xf32, #tpu.memory_space<vmem>>, vector<8x128xf32>,
    %c1_i32 = arith.constant 1 : i32
    %9 = arith.cmpi eq, %arg2, %c1_i32 : i32
    %10 = arith.extui %9 : i1 to i32
    %c0_i32_8 = arith.constant 0 : i32
    %11 = arith.cmpi ne, %10, %c0_i32_8 : i32
    scf.if %11 {
      %c0_9 = arith.constant 0 : index
      %c0_10 = arith.constant 0 : index
      %12 = vector.load %arg6[%c0_9, %c0_10] : memref<8x128xf32, #tpu.memory_space<vmem>>, vector<8x128xf32>
      %c0_11 = arith.constant 0 : index
      %c0_12 = arith.constant 0 : index
      %13 = vector.load %arg5[%c0_11, %c0_12] : memref<8x128xf32, #tpu.memory_space<vmem>>, vector<8x128xf32>
      tpu.vector_store %arg5[%c0_11, %c0_12], %12 {strides = array<i32>} : memref<8x128xf32, #tpu.memory_space<vmem>>, vector<8x128xf32>,
    } else {
    }
    return
  }
  func.func @transform_0(%arg0: i32, %arg1: i32, %arg2: i32) -> (i32, i32) {
    %c0_i32 = arith.constant 0 : i32
    return %arg0, %arg2 : i32, i32
  }
  func.func @transform_1(%arg0: i32, %arg1: i32, %arg2: i32) -> (i32, i32) {
    %c0_i32 = arith.constant 0 : i32
    return %arg2, %arg1 : i32, i32
  }
  func.func @transform_2(%arg0: i32, %arg1: i32, %arg2: i32) -> (i32, i32) {
    %c0_i32 = arith.constant 0 : i32
    return %arg0, %arg1 : i32, i32
  }
}

</mosaic_0001>

<bundles_post_ra>
// kernel: tpu_custom_call.1
= control target key start
LH: loop header
LB: loop body
LE: loop exit
PB: predicated region body
PF: predicated region fallthrough
CT: control target
= control target key end

     0   :  { %7 = vsyncpa [#allocation4], 0  ;;  %s1007_s0 = inlined_call_operand.hbm [shape: f32[8,512], index: 0, kind: input, shape index: {}]   ;;  %s1008_s1 = inlined_call_operand.hbm [shape: f32[512,128], index: 1, kind: input, shape index: {}]   ;;  %s1009_s2 = inlined_call_operand.hbm [shape: f32[8,128], index: 2, kind: output, shape index: {}]  }
   0x1   :  { %9 = vsyncpa [#allocation4 + $0x1], 0 }
   0x2   :  { %10 = vsyncpa [#allocation7], 0 }
   0x3   :  { %12 = vsyncpa [#allocation7 + $0x1], 0 }
   0x4   :  { %13 = vsyncpa [#allocation5], 0  ;;  %s768_s9 = smov 0   ;;  %s770_s10 = smov 0  }
   0x5   :  { %s772_s11 = smov 0   ;;  %s774_s12 = smov 0  }
   0x6   :  { %s776_s13 = smov 0   ;;  %s778_s14 = smov 0  }
   0x7 LB: > { %s444_s15 = sadd.s32 4294967295, %s745_s14   ;;  %s31_s16 = sadd.s32 1, %s741_s13  ;;  %s745_s14 = sphi %s778_s14, %s19_s14   ;;  %s741_s13 = sphi %s776_s13, %s1023_s13   ;;  %s737_s12 = sphi %s774_s12, %s1022_s12   ;;  %s733_s11 = sphi %s772_s11, %s1021_s11   ;;  %s729_s10 = sphi %s770_s10, %s1020_s10   ;;  %s725_s9 = sphi %s768_s9, %s1019_s9  }
   0x8   : > { %p32_p0 = scmp.ge.s32.totalorder %s31_s16, 2  ;;  %s47_s17 = sadd.s32 1, %s733_s11 }
   0x9   : > { %p54_p1 = scmp.ne.s32.totalorder %s733_s11, %s729_s10  ;;  %p55_p2 = scmp.eq.s32.totalorder %s745_s14, 0 }
   0xa   : > { %s1025_s16 = smov (%p32_p0, %s31_s16), 0  ;;  %p60_p4 = scmp.ne.s32.totalorder %s729_s10, %s725_s9 }
   0xb   : > { %p804_p3 = por %p55_p2, %p54_p1  ;;  %s43_s19 = ssub.s32 %s741_s13, %s1025_s16 }
   0xc   : > { %p61_p5 = scmp.eq.s32.totalorder %s444_s15, 0  ;;  %p45_p6 = scmp.eq.s32.totalorder %s43_s19, 0 }
   0xd   : > { %p546_p8 = scmp.lt.s32.totalorder %s745_s14, 2  ;;  %s822_s22 = sand.u32 1, %s733_s11  }
   0xe   : > { %p813_p7 = por %p61_p5, %p60_p4  ;;  %s462_s23 = sshll.u32 %s741_s13, 8 }
   0xf   : > { %s819_s21 = scalar_select %p45_p6, %s733_s11, %s47_s17  }
  0x10   : > { %s1012_s20 = scalar_select %p813_p7, 1, 0 }
  0x11   : > { %s447_s24 = sshll.u32 %s822_s22, 4  ;;  %s829_s27 = scalar_lea.hbm %s1007_s0, %s462_s23 }
  0x12   : > { %s144_s28 = scalar_lea.vmem [#allocation3], %s447_s24  ;;  %p833_p9 = pnand %p546_p8, %p804_p3 }
  0x13   : > { %s154_s29 = sshll.u32 %s144_s28, 4  ;;  %s141_s3 = scalar_lea.sflag [#allocation4], %s822_s22  ;;  %s837_s29 = int_to_ptr.vmem [resolvable:$true] %s154_s29 }
  0x14   : > { %s601_s4 = scalar_lea.hbm %s829_s27, 256  ;;  %p603_p13 = pneg %p833_p9 }
  0x15   : > { %p602_p12 = scmp.ne.s32.totalorder %s829_s27, %s601_s4  ;;  %s606_s7 = scalar_lea.hbm %s1007_s0, 512 }
  0x16   : > { %p607_p2 = scmp.lt.u32.totalorder %s829_s27, %s1007_s0  ;;  %p608_p3 = scmp.lt.u32.totalorder %s606_s7, %s601_s4 }
  0x17   : > { %p604_p0 = pnand %p603_p13, %p602_p12  ;;  %p610_p5 = scmp.lt.u32.totalorder %s601_s4, %s829_s27 }
  0x18   : > { %p609_p4 = por %p608_p3, %p607_p2 }
  0x19   : > { %p605_p1 = pneg %p604_p0 }
  0x1a   : > { %p611_p6 = por %p610_p5, %p609_p4 }
  0x1c   : > { %p612_p8 = pnand %p611_p6, %p605_p1 }
  0x1e   : > { %615 = shalt.err (!%p612_p8)
}
  0x1f   : > { %s616_s17 = scalar_lea.vmem %s837_s29, 256  ;;  %s747_s18 = smov [#allocation3]  }
  0x20   : > { %p617_p12 = scmp.ne.s32.totalorder %s837_s29, %s616_s17  ;;  %s621_s19 = sshll.u32 %s747_s18, 4  ;;  %s622_s19 = int_to_ptr.vmem [resolvable:$false] %s621_s19 }
  0x21   : > { %s623_s23 = scalar_lea.vmem %s622_s19, 512  ;;  %p624_p11 = scmp.lt.s32.totalorder %s837_s29, %s622_s19 }
  0x22   : > { %p619_p0 = pnand %p617_p12, %p603_p13  ;;  %p625_p2 = scmp.lt.s32.totalorder %s623_s23, %s616_s17 }
  0x24   : > { %p620_p10 = pneg %p619_p0  ;;  %p626_p3 = por %p625_p2, %p624_p11 }
  0x26   : > { %p627_p4 = pnand %p626_p3, %p620_p10 }
  0x28   : > { %630 = shalt.err (!%p627_p4)
}
  0x29   : > { %542 = dma.hbm_to_vmem [thread:$0]  (!%p833_p9), %s829_s27, 256, %s837_s29, %s141_s3  }
  0x2a   : > { %p1014_p1 = scmp.lt.s32.totalorder %s745_s14, 3  ;;  %p1015_p5 = scmp.ge.s32.totalorder %s745_s14, 1 }
  0x2b   : > { %s450_s25 = sshll.u32 %s822_s22, 8  ;;  %s463_s26 = sshll.u32 %s741_s13, 12 }
  0x2c   : > { %p871_p6 = pnand %p1015_p5, %p1014_p1  ;;  %s880_s5 = scalar_lea.hbm %s1008_s1, %s463_s26 }
  0x2d   : > { %s165_s6 = scalar_lea.vmem [#allocation6], %s450_s25  ;;  %s162_s27 = scalar_lea.sflag [#allocation7], %s822_s22 }
  0x2e   : > { %s173_s7 = sshll.u32 %s165_s6, 4  ;;  %s631_s29 = scalar_lea.hbm %s880_s5, 4096  ;;  %s882_s7 = int_to_ptr.vmem [resolvable:$true] %s173_s7 }
  0x2f   : > { %p632_p10 = scmp.ne.s32.totalorder %s880_s5, %s631_s29  ;;  %s636_s9 = scalar_lea.hbm %s1008_s1, 8192 }
  0x30   : > { %p637_p12 = scmp.lt.u32.totalorder %s880_s5, %s1008_s1  ;;  %p638_p0 = scmp.lt.u32.totalorder %s636_s9, %s631_s29 }
  0x31   : > { %p634_p11 = pnand %p632_p10, %p603_p13  ;;  %p640_p3 = scmp.lt.u32.totalorder %s631_s29, %s880_s5 }
  0x32   : > { %p639_p2 = por %p638_p0, %p637_p12 }
  0x33   : > { %p635_p8 = pneg %p634_p11 }
  0x34   : > { %p641_p4 = por %p640_p3, %p639_p2 }
  0x36   : > { %p642_p1 = pnand %p641_p4, %p635_p8 }
  0x38   : > { %645 = shalt.err (!%p642_p1)
}
  0x39   : > { %s646_s19 = scalar_lea.vmem %s882_s7, 4096  ;;  %s748_s23 = smov [#allocation6]  }
  0x3a   : > { %p647_p5 = scmp.ne.s32.totalorder %s882_s7, %s646_s19  ;;  %s651_s25 = sshll.u32 %s748_s23, 4  ;;  %s652_s25 = int_to_ptr.vmem [resolvable:$false] %s651_s25 }
  0x3b   : > { %s653_s26 = scalar_lea.vmem %s652_s25, 8192  ;;  %p654_p7 = scmp.lt.s32.totalorder %s882_s7, %s652_s25 }
  0x3c   : > { %p649_p10 = pnand %p647_p5, %p603_p13  ;;  %p655_p12 = scmp.lt.s32.totalorder %s653_s26, %s646_s19 }
  0x3e   : > { %p650_p11 = pneg %p649_p10  ;;  %p656_p0 = por %p655_p12, %p654_p7 }
  0x40   : > { %p657_p2 = pnand %p656_p0, %p650_p11 }
  0x42   : > { %660 = shalt.err (!%p657_p2)
}
  0x43   : > { %s749_s28 = smov 128   ;;  %s750_s4 = smov 8  }
  0x44   : > { %545 = dma.hbm_to_vmem [thread:$0]  (!%p833_p9), %s880_s5, 4096, %s882_s7, %s162_s27, %s749_s28, %s749_s28, %s750_s4  }
  0x45   : > { %185 = sbr.rel (%p871_p6) target bundleno = 375 (0x177), region = 28  ;;  %s187_s6 = sand.u32 (!%p871_p6), 1, %s729_s10  }
  0x46   : > { %s454_s29 = sshll.u32 (!%p871_p6), %s187_s6, 4  ;;  %s188_s3 = scalar_lea.sflag (!%p871_p6), [#allocation4], %s187_s6 }
  0x47   : > { %s913_s8 = scalar_lea.vmem (!%p871_p6), [#allocation3], %s454_s29  ;;  %p1017_p7 = scmp.ne.s32.totalorder (!%p871_p6), %s1012_s20, 0 }
  0x4c   : > { %712 = dma.done.wait (%p1017_p7), %s188_s3, 256  }
  0x4d   : > { %714 = vsyncadd (%p1017_p7), %s188_s3, 4294967040  ;;  %s455_s9 = sshll.u32 %s187_s6, 8  ;;  %s197_s30 = scalar_lea.sflag [#allocation7], %s187_s6 }
  0x4e   : > { %s919_s22 = scalar_lea.vmem [#allocation6], %s455_s9 }
  0x4f   : > { %716 = dma.done.wait (%p1017_p7), %s197_s30, 4096  }
  0x50   : > { %718 = vsyncadd (%p1017_p7), %s197_s30, 4294963200  ;;  %p456_p9 = scmp.ne.s32.totalorder %s737_s12, 0 }
  0x51   : > { %v751_v0 = vmov (!%p456_p9), 0.0  }
  0x52   : > { %226 = sbr.rel (%p456_p9) target bundleno = 89 (0x59), region = 40  ;;  %227 = vst [vmem:[#allocation2] sm:$0xff] (!%p456_p9), %v751_v0 }
  0x59 PF: > { %v247_v1 = vld [vmem:[%s919_s22 + $0x80] sm:$0xff]  ;;  %v248_v2 = vld [vmem:[%s919_s22 + $0x88] sm:$0xff]  ;;  %v249_v6 = vld [vmem:[%s919_s22 + $0x90] sm:$0xff]  ;;  %p457_p13 = scmp.ne.s32.totalorder %s737_s12, 1 }
  0x5a   : > { %v231_v3 = vld [vmem:[%s919_s22] sm:$0xff]  ;;  %v499_v4 = vpack.c.bf16 %v248_v2, %v247_v1  ;;  %v232_v5 = vld [vmem:[%s919_s22 + $0x8] sm:$0xff]  ;;  %v250_v7 = vld [vmem:[%s919_s22 + $0x98] sm:$0xff] }
  0x5b   : > { %v501_v8 = vpack.c.bf16 %v232_v5, %v231_v3  ;;  %v503_v9 = vpack.c.bf16 %v250_v7, %v249_v6  ;;  %v233_v10 = vld [vmem:[%s919_s22 + $0x10] sm:$0xff]  ;;  %v234_v11 = vld [vmem:[%s919_s22 + $0x18] sm:$0xff]  ;;  %v251_v12 = vld [vmem:[%s919_s22 + $0xa0] sm:$0xff] }
  0x5c   : > { %500 = vmatprep.subr.bf16.mxu0 %v499_v4  ;;  %v252_v13 = vld [vmem:[%s919_s22 + $0xa8] sm:$0xff]  ;;  %v505_v14 = vpack.c.bf16 %v234_v11, %v233_v10  ;;  %v235_v16 = vld [vmem:[%s919_s22 + $0x20] sm:$0xff]  ;;  %v253_v18 = vld [vmem:[%s919_s22 + $0xb0] sm:$0xff] }
  0x5d   : > { %502 = vmatpush3.bf16.msra.mxu0 %v501_v8  ;;  %v507_v15 = vpack.c.bf16 %v252_v13, %v251_v12  ;;  %v236_v17 = vld [vmem:[%s919_s22 + $0x28] sm:$0xff]  ;;  %v254_v19 = vld [vmem:[%s919_s22 + $0xb8] sm:$0xff]  ;;  %v237_v22 = vld [vmem:[%s919_s22 + $0x30] sm:$0xff] }
  0x5e   : > { %504 = vmatprep.subr.bf16.mxu0 %v503_v9  ;;  %v509_v20 = vpack.c.bf16 %v236_v17, %v235_v16  ;;  %v511_v21 = vpack.c.bf16 %v254_v19, %v253_v18  ;;  %v238_v23 = vld [vmem:[%s919_s22 + $0x38] sm:$0xff]  ;;  %v255_v24 = vld [vmem:[%s919_s22 + $0xc0] sm:$0xff]  ;;  %v256_v25 = vld [vmem:[%s919_s22 + $0xc8] sm:$0xff] }
  0x5f   : > { %v230_v26 = vld [vmem:[%s913_s8 + $0x8] sm:$0xff]  ;;  %v513_v27 = vpack.c.bf16 %v238_v23, %v237_v22  ;;  %v515_v28 = vpack.c.bf16 %v256_v25, %v255_v24  ;;  %v239_v29 = vld [vmem:[%s919_s22 + $0x40] sm:$0xff]  ;;  %v257_v31 = vld [vmem:[%s919_s22 + $0xd0] sm:$0xff] }
  0x60   : > { %327 = vmatprep.mubr.f32.mxu0 %v230_v26  ;;  %v240_v30 = vld [vmem:[%s919_s22 + $0x48] sm:$0xff]  ;;  %v258_v32 = vld [vmem:[%s919_s22 + $0xd8] sm:$0xff]  ;;  %v241_v35 = vld [vmem:[%s919_s22 + $0x50] sm:$0xff] }
  0x61   : > { %506 = vmatpush3.bf16.msra.mxu0 %v505_v14  ;;  %v517_v33 = vpack.c.bf16 %v240_v30, %v239_v29  ;;  %v519_v34 = vpack.c.bf16 %v258_v32, %v257_v31  ;;  %v242_v36 = vld [vmem:[%s919_s22 + $0x58] sm:$0xff]  ;;  %v259_v37 = vld [vmem:[%s919_s22 + $0xe0] sm:$0xff]  ;;  %v260_v38 = vld [vmem:[%s919_s22 + $0xe8] sm:$0xff] }
  0x62   : > { %508 = vmatprep.subr.bf16.mxu0 %v507_v15  ;;  %v521_v39 = vpack.c.bf16 %v242_v36, %v241_v35  ;;  %v523_v40 = vpack.c.bf16 %v260_v38, %v259_v37  ;;  %v243_v41 = vld [vmem:[%s919_s22 + $0x60] sm:$0xff]  ;;  %v244_v42 = vld [vmem:[%s919_s22 + $0x68] sm:$0xff]  ;;  %v261_v43 = vld [vmem:[%s919_s22 + $0xf0] sm:$0xff] }
  0x63   : > { %v262_v44 = vld [vmem:[%s919_s22 + $0xf8] sm:$0xff]  ;;  %v525_v45 = vpack.c.bf16 %v244_v42, %v243_v41  ;;  %v245_v47 = vld [vmem:[%s919_s22 + $0x70] sm:$0xff] }
  0x64   : > { %v527_v46 = vpack.c.bf16 %v262_v44, %v261_v43  ;;  %v246_v48 = vld [vmem:[%s919_s22 + $0x78] sm:$0xff]  ;;  %v229_v50 = vld [vmem:[%s913_s8] sm:$0xff] }
  0x65   : > { %510 = vmatpush3.bf16.msra.mxu0 %v509_v20  ;;  %v529_v49 = vpack.c.bf16 %v246_v48, %v245_v47  ;;  %v228_v52 = vld [vmem:[#allocation2] sm:$0xff] }
  0x66   : > { %512 = vmatprep.subr.bf16.mxu0 %v511_v21 }
  0x69   : > { %514 = vmatpush3.bf16.msra.mxu0 %v513_v27 }
  0x6a   : > { %516 = vmatprep.subr.bf16.mxu0 %v515_v28 }
  0x6d   : > { %518 = vmatpush3.bf16.msra.mxu0 %v517_v33 }
  0x6e   : > { %520 = vmatprep.subr.bf16.mxu0 %v519_v34 }
  0x71   : > { %522 = vmatpush3.bf16.msra.mxu0 %v521_v39 }
  0x72   : > { %524 = vmatprep.subr.bf16.mxu0 %v523_v40 }
  0x75   : > { %526 = vmatpush3.bf16.msra.mxu0 %v525_v45 }
  0x76   : > { %528 = vmatprep.subr.bf16.mxu0 %v527_v46 }
  0x79   : > { %530 = vmatpush3.bf16.msra.mxu0 %v529_v49 }
  0x7c   : > { %328 = vmatmul.mubr.f32.vlgmr.msra.gmra.mrb[0].mxu0 %v229_v50 }
 0x14f   : > { %v496_v51 = vpop.f32.mrb[0].mxu0  ;;  %338 = sbr.rel (%p457_p13) target bundleno = 350 (0x15e), region = 44 }
 0x150   : > { %v497_v53 = vpop.f32.mrb[1].mxu0 }
 0x151   : > { %v498_v54 = vadd.f32 %v497_v53, %v496_v51 }
 0x153   : > { %v333_v55 = vadd.f32 %v498_v54, %v228_v52 }
 0x155   : > { %334 = vst [vmem:[#allocation2] sm:$0xff] %v333_v55 }
 0x15c   : > { %v339_v56 = vld [vmem:[#allocation2] sm:$0xff] }
 0x15d   : > { %340 = vst [vmem:[#allocation8] sm:$0xff] %v339_v56 }
 0x15e PF: > { %p963_p6 = scmp.eq.s32.totalorder %s444_s15, 1  ;;  %s752_s24 = smov [#allocation8]  }
 0x15f   : > { %s351_s5 = sshll.u32 %s752_s24, 4  ;;  %s352_s5 = int_to_ptr.vmem [resolvable:$true] %s351_s5 }
 0x160   : > { %s661_s7 = scalar_lea.vmem %s352_s5, 128  ;;  %p668_p1 = scmp.lt.s32.totalorder %s352_s5, %s352_s5 }
 0x161   : > { %p662_p8 = scmp.ne.s32.totalorder %s352_s5, %s661_s7  ;;  %p669_p5 = scmp.lt.s32.totalorder %s661_s7, %s661_s7 }
 0x163   : > { %p663_p3 = pnand %p662_p8, %p963_p6  ;;  %p670_p10 = por %p669_p5, %p668_p1 }
 0x165   : > { %p664_p4 = pneg %p663_p3 }
 0x167   : > { %p671_p11 = pnand %p670_p10, %p664_p4 }
 0x169   : > { %674 = shalt.err (!%p671_p11)
}
 0x16a   : > { %s675_s15 = scalar_lea.hbm %s1009_s2, 128 }
 0x16b   : > { %p676_p12 = scmp.ne.s32.totalorder %s1009_s2, %s675_s15  ;;  %p681_p7 = scmp.lt.u32.totalorder %s675_s15, %s1009_s2 }
 0x16d   : > { %p677_p0 = pnand %p676_p12, %p963_p6 }
 0x16f   : > { %p678_p2 = pneg %p677_p0 }
 0x171   : > { %p683_p9 = pnand %p681_p7, %p678_p2 }
 0x173   : > { %686 = shalt.err (!%p683_p9)
}
 0x174   : > { %536 = dma.vmem_to_hbm [thread:$0]  (%p963_p6), %s352_s5, 128, %s1009_s2, [#allocation5]  }
 0x175   : > { %720 = dma.done.wait (%p963_p6), [#allocation5], 128  }
 0x176   : > { %722 = vsyncadd (%p963_p6), [#allocation5], 4294967168 }
 0x177 PF: > { %s19_s14 = sadd.s32 1, %s745_s14   ;;  %s1019_s9 = smov %s729_s10 }
 0x178   : > { %p16_p13 = scmp.ge.s32.totalorder %s19_s14, 4   ;;  %s1020_s10 = smov %s733_s11 }
 0x179   : > { %s1021_s11 = smov %s819_s21  ;;  %s1022_s12 = smov %s741_s13 }
 0x17a   : > { %s1023_s13 = smov %s1025_s16  ;;  %18 = sbr.rel (!%p16_p13) target bundleno = 7 (0x7), region = 87 }
 0x181   :  { %364 = vsyncpa [#allocation4], 1 }
 0x182   :  { %366 = vsyncpa [#allocation4 + $0x1], 1 }
 0x183   :  { %367 = vsyncpa [#allocation7], 1 }
 0x184   :  { %369 = vsyncpa [#allocation7 + $0x1], 1 }
 0x185   :  { %370 = vsyncpa [#allocation5], 1 }
 0x186   :  { %372 = vsyncpa [#allocation5 + $0x1], 1 }

</bundles_post_ra>
